<compile_context>
chip_gen: v6e
topology: v6e:2x2x1
jax: 0.10.0
libtpu: 0.0.40
codegen_flags: <defaults>
</compile_context>

<pallas_src>
import functools

import jax
import jax.numpy as jnp
from jax import lax
from jax.experimental import pallas as pl
from jax.experimental.pallas import tpu as pltpu

LANE = 128
SUBLANE = 8


def _round_up(x, m):
    return (x + m - 1) // m * m


def make_concatnet_kernel(num_layers, num_users, n_tot, tb, out_lo, out_hi):
    """Kernel body with a static number of FC layers.

    Ref order (all VMEM, no scratch):
      uidx (TB, 1) i32, iidx (TB, 1) i32,
      emb_cat (n_tot, 2E),
      [W_l, b_l] * num_layers            (BN already folded into weights in the wrapper),
      wh (1, Hlast_p), bh (1, 1),
      out block (1, 1, TB)
    """

    def kernel(*refs):
        uidx_ref, iidx_ref, emb_ref = refs[0], refs[1], refs[2]
        ptr = 3
        layers = []
        for _ in range(num_layers):
            layers.append((refs[ptr], refs[ptr + 1]))
            ptr += 2
        wh_ref, bh_ref, out_ref = refs[ptr], refs[ptr + 1], refs[ptr + 2]

        # --- Embedding gather + torch.cat as ONE one-hot matmul against the block-diagonal
        #     concat table: row u -> [U[u], 0], row NU+i -> [0, I[i]]  =>  x = [U[u], I[i]]. ---
        u = uidx_ref[...]                                   # (TB, 1)
        it = iidx_ref[...] + num_users                      # (TB, 1)
        cols = lax.broadcasted_iota(jnp.int32, (tb, n_tot), 1)
        onehot = jnp.logical_or(cols == u, cols == it).astype(emb_ref.dtype)
        x = jnp.dot(onehot, emb_ref[...], preferred_element_type=jnp.float32)   # (TB, 2E)

        # --- FC stack: Linear -> ReLU.  (BatchNorm1d(eval) folded into the next layer's W/b;
        #     Dropout is identity at inference.) ---
        for w_ref, b_ref in layers:
            x = jnp.dot(x, w_ref[...], preferred_element_type=jnp.float32) + b_ref[...]
            x = jnp.maximum(x, 0.0)

        # --- Head as (1, H) @ x^T -> (1, TB): batch ends up on the lane axis (dense stores). ---
        y = lax.dot_general(wh_ref[...], x, (((1,), (1,)), ((), ())),
                            preferred_element_type=jnp.float32) + bh_ref[...]
        y = jax.nn.sigmoid(y)
        y = y * (out_hi - out_lo) + out_lo
        out_ref[...] = y.reshape(1, 1, tb)

    return kernel


def concatnet_forward(user_idx, item_idx, params, config, *, tile_b=512):
    """Folds parameters (concat table, BN-into-weights, lane padding) and runs the kernel."""
    fc_sizes = config['fc_layer_sizes']
    num_layers = len(fc_sizes) - 1
    out_lo, out_hi = (float(v) for v in config['out_range'])
    E = config['emb_size']
    NU, NI = config['num_users'], config['num_items']
    eps = 1e-5
    assert fc_sizes[0] == 2 * E, "first FC layer input must be 2 * emb_size"

    B = user_idx.shape[0]
    TB = _round_up(min(tile_b, _round_up(B, LANE)), LANE)
    B_pad = _round_up(B, TB)
    G = B_pad // TB

    # Indices as (B_pad, 1) int32 VMEM blocks.  Clamp to table range (torch would raise on OOB);
    # padded batch rows reuse index 0 and are sliced away afterwards.
    uidx = jnp.clip(user_idx.reshape(-1).astype(jnp.int32), 0, NU - 1)
    iidx = jnp.clip(item_idx.reshape(-1).astype(jnp.int32), 0, NI - 1)
    uidx = jnp.pad(uidx, (0, B_pad - B)).reshape(B_pad, 1)
    iidx = jnp.pad(iidx, (0, B_pad - B)).reshape(B_pad, 1)

    # --- Block-diagonal concat table (tables are tiny -> keep VMEM-resident). ---
    n_tot = _round_up(NU + NI, SUBLANE)
    emb_cat = jnp.zeros((n_tot, 2 * E), jnp.float32)
    emb_cat = emb_cat.at[:NU, :E].set(params['emb_user'])
    emb_cat = emb_cat.at[NU:NU + NI, E:].set(params['emb_item'])

    # --- Fold each layer's BatchNorm1d(eval) into the NEXT layer's (or the head's) weights.
    #     y = relu(a)*s + t  =>  y @ W + b = relu(a) @ (diag(s) W) + (t @ W + b). ---
    eff = []
    s_prev = t_prev = None
    for l in range(num_layers):
        lp = params['fc'][l]
        W = lp['W']
        b = lp['b'].reshape(1, -1)
        if l > 0:
            b = t_prev @ W + b              # shift folds through the (original) next weight
            W = s_prev[:, None] * W         # scale folds into the next weight's input rows
        eff.append((W, b))
        s_prev = (lp['gamma'] * lax.rsqrt(lp['var'] + eps)).reshape(-1)
        t_prev = (lp['beta'].reshape(-1) - lp['mean'].reshape(-1) * s_prev).reshape(1, -1)

    Wh = params['head_W']
    bh = t_prev @ Wh + params['head_b'].reshape(1, 1)
    Wh = s_prev[:, None] * Wh

    # --- Pad hidden dims to 128 lanes so all activation/weight tiles are lane-aligned. ---
    def pad_cols(a, n):
        return jnp.pad(a, ((0, 0), (0, n - a.shape[1])))

    def pad_rows(a, n):
        return jnp.pad(a, ((0, n - a.shape[0]), (0, 0)))

    hidden_pad = [_round_up(h, LANE) for h in fc_sizes[1:]]

    weights = []
    W0, b0 = eff[0]
    weights += [pad_cols(W0, hidden_pad[0]), pad_cols(b0, hidden_pad[0])]
    for l in range(1, num_layers):
        Wl, bl = eff[l]
        weights += [pad_cols(pad_rows(Wl, hidden_pad[l - 1]), hidden_pad[l]),
                    pad_cols(bl, hidden_pad[l])]
    weights += [pad_cols(Wh.T, hidden_pad[-1]),   # head as (1, Hlast_p)
                bh.reshape(1, 1)]

    kernel = make_concatnet_kernel(num_layers, NU, n_tot, TB, out_lo, out_hi)

    idx_spec = pl.BlockSpec((TB, 1), lambda g: (g, 0))
    # Full-array blocks with constant index_map -> VMEM-resident across the whole grid.
    const_specs = [pl.BlockSpec(w.shape, lambda g: (0, 0)) for w in [emb_cat] + weights]

    grid_spec = pltpu.PrefetchScalarGridSpec(
        num_scalar_prefetch=0,
        grid=(G,),
        in_specs=[idx_spec, idx_spec] + const_specs,
        out_specs=pl.BlockSpec((1, 1, TB), lambda g: (g, 0, 0)),
    )

    out = pl.pallas_call(
        kernel,
        out_shape=jax.ShapeDtypeStruct((G, 1, TB), jnp.float32),
        grid_spec=grid_spec,
        compiler_params=pltpu.CompilerParams(dimension_semantics=("parallel",)),
    )(uidx, iidx, emb_cat, *weights)

    return out.reshape(B_pad)[:B].reshape(B, 1)


def init_params(key, config):
    """Deterministic parameter init mirroring the PyTorch module's shapes.

    BatchNorm stats/affine are randomized (as after training) so the eval-mode BN fold is
    actually exercised by the correctness check.
    """
    fc_sizes = config['fc_layer_sizes']
    num_layers = len(fc_sizes) - 1
    keys = jax.random.split(key, 4 + 6 * num_layers)

    def xavier_uniform(k, shape):
        fan_in, fan_out = shape[0], shape[1]
        bound = jnp.sqrt(6.0 / (fan_in + fan_out))
        return jax.random.uniform(k, shape, jnp.float32, -bound, bound)

    params = {
        'emb_user': xavier_uniform(keys[0], (config['num_users'], config['emb_size'])),
        'emb_item': xavier_uniform(keys[1], (config['num_items'], config['emb_size'])),
        'fc': [],
    }
    kp = 2
    for ni, nf in zip(fc_sizes[:-1], fc_sizes[1:]):
        bound = 1.0 / jnp.sqrt(ni)
        params['fc'].append({
            'W': jax.random.uniform(keys[kp], (ni, nf), jnp.float32, -bound, bound),
            'b': jax.random.uniform(keys[kp + 1], (1, nf), jnp.float32, -bound, bound),
            'gamma': 1.0 + 0.2 * jax.random.normal(keys[kp + 2], (1, nf), jnp.float32),
            'beta': 0.1 * jax.random.normal(keys[kp + 3], (1, nf), jnp.float32),
            'mean': 0.1 * jax.random.normal(keys[kp + 4], (1, nf), jnp.float32),
            'var': jax.random.uniform(keys[kp + 5], (1, nf), jnp.float32, 0.5, 1.5),
        })
        kp += 6
    nf_last = fc_sizes[-1]
    hbound = 1.0 / jnp.sqrt(nf_last)
    params['head_W'] = jax.random.uniform(keys[kp], (nf_last, 1), jnp.float32, -hbound, hbound)
    params['head_b'] = jax.random.uniform(keys[kp + 1], (1, 1), jnp.float32, -hbound, hbound)
    return params


if __name__ == "__main__":
    config = {
        'num_users': 32,
        'num_items': 48,
        'emb_size': 16,
        'emb_dropout': 0.0,
        'fc_layer_sizes': [32, 64, 32],   # first layer input = 2 * emb_size
        'dropout': [0.1, 0.1],
        'out_range': [1.0, 5.0],
    }

    key = jax.random.PRNGKey(0)
    pkey, ukey, ikey = jax.random.split(key, 3)
    params = init_params(pkey, config)

    B = 8
    user_idx = jax.random.randint(ukey, (B,), 0, config['num_users'], dtype=jnp.int32)
    item_idx = jax.random.randint(ikey, (B,), 0, config['num_items'], dtype=jnp.int32)

    fwd = jax.jit(functools.partial(concatnet_forward, config=config))
    out = jax.block_until_ready(fwd(user_idx, item_idx, params))

    # Pure-JAX reference (same math as the PyTorch forward in eval mode).
    def ref_fwd(uid, iid, p):
        x = jnp.concatenate([p['emb_user'][uid], p['emb_item'][iid]], axis=1)
        for lp in p['fc']:
            x = jnp.maximum(x @ lp['W'] + lp['b'], 0.0)
            x = (x - lp['mean']) * lax.rsqrt(lp['var'] + 1e-5) * lp['gamma'] + lp['beta']
        y = jax.nn.sigmoid(x @ p['head_W'] + p['head_b'])
        lo, hi = config['out_range']
        return y * (hi - lo) + lo

    ref = ref_fwd(user_idx, item_idx, params)

    assert out.shape == (B, 1)
    assert bool(jnp.all(out >= config['out_range'][0]) & jnp.all(out <= config['out_range'][1]))
    assert bool(jnp.allclose(out, ref, atol=1e-3, rtol=1e-3)), (
        f"max abs err {float(jnp.max(jnp.abs(out - ref)))}")
    print("KERNEL_OK")
</pallas_src>

<mosaic_0001>
module attributes {stable_mosaic.version = 11 : i64} {
  func.func @kernel(%arg0: i32, %arg1: memref<128x1xi32, #tpu.memory_space<vmem>>, %arg2: memref<128x1xi32, #tpu.memory_space<vmem>>, %arg3: memref<80x32xf32, #tpu.memory_space<vmem>>, %arg4: memref<32x128xf32, #tpu.memory_space<vmem>>, %arg5: memref<1x128xf32, #tpu.memory_space<vmem>>, %arg6: memref<128x128xf32, #tpu.memory_space<vmem>>, %arg7: memref<1x128xf32, #tpu.memory_space<vmem>>, %arg8: memref<1x128xf32, #tpu.memory_space<vmem>>, %arg9: memref<1x1xf32, #tpu.memory_space<vmem>>, %arg10: memref<1x1x128xf32, #tpu.memory_space<vmem>>) attributes {dimension_semantics = [#tpu.dimension_semantics<parallel>], iteration_bounds = array<i64: 1>, scalar_prefetch = 0 : i64, scratch_operands = 0 : i64, tpu.core_type = #tpu.core_type<tc>, window_params = [{transform_indices = @transform_0, window_bounds = array<i64: 128, 1>}, {transform_indices = @transform_1, window_bounds = array<i64: 128, 1>}, {pipeline_mode = #tpu.pipeline_mode<synchronous>, transform_indices = @transform_2, window_bounds = array<i64: 80, 32>}, {pipeline_mode = #tpu.pipeline_mode<synchronous>, transform_indices = @transform_3, window_bounds = array<i64: 32, 128>}, {pipeline_mode = #tpu.pipeline_mode<synchronous>, transform_indices = @transform_4, window_bounds = array<i64: 1, 128>}, {pipeline_mode = #tpu.pipeline_mode<synchronous>, transform_indices = @transform_5, window_bounds = array<i64: 128, 128>}, {pipeline_mode = #tpu.pipeline_mode<synchronous>, transform_indices = @transform_6, window_bounds = array<i64: 1, 128>}, {pipeline_mode = #tpu.pipeline_mode<synchronous>, transform_indices = @transform_7, window_bounds = array<i64: 1, 128>}, {pipeline_mode = #tpu.pipeline_mode<synchronous>, transform_indices = @transform_8, window_bounds = array<i64: 1, 1>}, {transform_indices = @transform_9, window_bounds = array<i64: 1, 1, 128>}]} {
    %c0 = arith.constant 0 : index
    %c0_0 = arith.constant 0 : index
    %0 = vector.load %arg1[%c0, %c0_0] : memref<128x1xi32, #tpu.memory_space<vmem>>, vector<128x1xi32>
    %c0_1 = arith.constant 0 : index
    %c0_2 = arith.constant 0 : index
    %1 = vector.load %arg2[%c0_1, %c0_2] : memref<128x1xi32, #tpu.memory_space<vmem>>, vector<128x1xi32>
    %c32_i32 = arith.constant 32 : i32
    %2 = vector.broadcast %c32_i32 : i32 to vector<128x1xi32>
    %3 = arith.addi %1, %2 : vector<128x1xi32>
    %4 = tpu.iota {dimensions = array<i32: 1>} : vector<128x80xi32>
    %5 = vector.broadcast %0 : vector<128x1xi32> to vector<128x80xi32>
    %6 = arith.cmpi eq, %4, %5 : vector<128x80xi32>
    %7 = vector.broadcast %3 : vector<128x1xi32> to vector<128x80xi32>
    %8 = arith.cmpi eq, %4, %7 : vector<128x80xi32>
    %9 = arith.ori %6, %8 : vector<128x80xi1>
    %10 = arith.extui %9 : vector<128x80xi1> to vector<128x80xi32>
    %11 = arith.sitofp %10 : vector<128x80xi32> to vector<128x80xf32>
    %c0_3 = arith.constant 0 : index
    %c0_4 = arith.constant 0 : index
    %12 = vector.load %arg3[%c0_3, %c0_4] : memref<80x32xf32, #tpu.memory_space<vmem>>, vector<80x32xf32>
    %cst = arith.constant dense<0.000000e+00> : vector<128x32xf32>
    %13 = tpu.matmul %11, %12, %cst {dimension_numbers = #tpu.dot_dimension_numbers<[1], [0], [0], [1], [0, 0, 1, 1], [], []>} : vector<128x80xf32>, vector<80x32xf32>, vector<128x32xf32> -> vector<128x32xf32>
    %c0_5 = arith.constant 0 : index
    %c0_6 = arith.constant 0 : index
    %14 = vector.load %arg4[%c0_5, %c0_6] : memref<32x128xf32, #tpu.memory_space<vmem>>, vector<32x128xf32>
    %cst_7 = arith.constant dense<0.000000e+00> : vector<128x128xf32>
    %15 = tpu.matmul %13, %14, %cst_7 {dimension_numbers = #tpu.dot_dimension_numbers<[1], [0], [0], [1], [0, 0, 1, 1], [], []>} : vector<128x32xf32>, vector<32x128xf32>, vector<128x128xf32> -> vector<128x128xf32>
    %c0_8 = arith.constant 0 : index
    %c0_9 = arith.constant 0 : index
    %16 = vector.load %arg5[%c0_8, %c0_9] : memref<1x128xf32, #tpu.memory_space<vmem>>, vector<1x128xf32>
    %17 = vector.broadcast %16 : vector<1x128xf32> to vector<128x128xf32>
    %18 = arith.addf %15, %17 : vector<128x128xf32>
    %cst_10 = arith.constant 0.000000e+00 : f32
    %19 = vector.broadcast %cst_10 : f32 to vector<128x128xf32>
    %20 = arith.maximumf %18, %19 : vector<128x128xf32>
    %c0_11 = arith.constant 0 : index
    %c0_12 = arith.constant 0 : index
    %21 = vector.load %arg6[%c0_11, %c0_12] : memref<128x128xf32, #tpu.memory_space<vmem>>, vector<128x128xf32>
    %cst_13 = arith.constant dense<0.000000e+00> : vector<128x128xf32>
    %22 = tpu.matmul %20, %21, %cst_13 {dimension_numbers = #tpu.dot_dimension_numbers<[1], [0], [0], [1], [0, 0, 1, 1], [], []>} : vector<128x128xf32>, vector<128x128xf32>, vector<128x128xf32> -> vector<128x128xf32>
    %c0_14 = arith.constant 0 : index
    %c0_15 = arith.constant 0 : index
    %23 = vector.load %arg7[%c0_14, %c0_15] : memref<1x128xf32, #tpu.memory_space<vmem>>, vector<1x128xf32>
    %24 = vector.broadcast %23 : vector<1x128xf32> to vector<128x128xf32>
    %25 = arith.addf %22, %24 : vector<128x128xf32>
    %cst_16 = arith.constant 0.000000e+00 : f32
    %26 = vector.broadcast %cst_16 : f32 to vector<128x128xf32>
    %27 = arith.maximumf %25, %26 : vector<128x128xf32>
    %c0_17 = arith.constant 0 : index
    %c0_18 = arith.constant 0 : index
    %28 = vector.load %arg8[%c0_17, %c0_18] : memref<1x128xf32, #tpu.memory_space<vmem>>, vector<1x128xf32>
    %cst_19 = arith.constant dense<0.000000e+00> : vector<1x128xf32>
    %29 = tpu.matmul %28, %27, %cst_19 {dimension_numbers = #tpu.dot_dimension_numbers<[1], [1], [0], [0], [0, 0, 1, 0], [], []>} : vector<1x128xf32>, vector<128x128xf32>, vector<1x128xf32> -> vector<1x128xf32>
    %c0_20 = arith.constant 0 : index
    %c0_21 = arith.constant 0 : index
    %30 = vector.load %arg9[%c0_20, %c0_21] : memref<1x1xf32, #tpu.memory_space<vmem>>, vector<1x1xf32>
    %31 = vector.broadcast %30 : vector<1x1xf32> to vector<1x128xf32>
    %32 = arith.addf %29, %31 : vector<1x128xf32>
    %33 = arith.negf %32 : vector<1x128xf32>
    %34 = math.exp %33 : vector<1x128xf32>
    %cst_22 = arith.constant 1.000000e+00 : f32
    %35 = vector.broadcast %cst_22 : f32 to vector<1x128xf32>
    %36 = arith.addf %35, %34 : vector<1x128xf32>
    %37 = arith.divf %35, %36 : vector<1x128xf32>
    %cst_23 = arith.constant 4.000000e+00 : f32
    %38 = vector.broadcast %cst_23 : f32 to vector<1x128xf32>
    %39 = arith.mulf %37, %38 : vector<1x128xf32>
    %cst_24 = arith.constant 1.000000e+00 : f32
    %40 = vector.broadcast %cst_24 : f32 to vector<1x128xf32>
    %41 = arith.addf %39, %40 : vector<1x128xf32>
    %42 = vector.shape_cast %41 : vector<1x128xf32> to vector<1x1x128xf32>
    %c0_25 = arith.constant 0 : index
    %c0_26 = arith.constant 0 : index
    %c0_27 = arith.constant 0 : index
    %43 = vector.load %arg10[%c0_25, %c0_26, %c0_27] : memref<1x1x128xf32, #tpu.memory_space<vmem>>, vector<1x1x128xf32>
    tpu.vector_store %arg10[%c0_25, %c0_26, %c0_27], %42 {strides = array<i32>} : memref<1x1x128xf32, #tpu.memory_space<vmem>>, vector<1x1x128xf32>,
    return
  }
  func.func @transform_0(%arg0: i32) -> (i32, i32) {
    %c0_i32 = arith.constant 0 : i32
    %c0_i32_0 = arith.constant 0 : i32
    return %arg0, %c0_i32 : i32, i32
  }
  func.func @transform_1(%arg0: i32) -> (i32, i32) {
    %c0_i32 = arith.constant 0 : i32
    %c0_i32_0 = arith.constant 0 : i32
    return %arg0, %c0_i32 : i32, i32
  }
  func.func @transform_2(%arg0: i32) -> (i32, i32) {
    %c0_i32 = arith.constant 0 : i32
    %c0_i32_0 = arith.constant 0 : i32
    %c0_i32_1 = arith.constant 0 : i32
    return %c0_i32, %c0_i32_0 : i32, i32
  }
  func.func @transform_3(%arg0: i32) -> (i32, i32) {
    %c0_i32 = arith.constant 0 : i32
    %c0_i32_0 = arith.constant 0 : i32
    %c0_i32_1 = arith.constant 0 : i32
    return %c0_i32, %c0_i32_0 : i32, i32
  }
  func.func @transform_4(%arg0: i32) -> (i32, i32) {
    %c0_i32 = arith.constant 0 : i32
    %c0_i32_0 = arith.constant 0 : i32
    %c0_i32_1 = arith.constant 0 : i32
    return %c0_i32, %c0_i32_0 : i32, i32
  }
  func.func @transform_5(%arg0: i32) -> (i32, i32) {
    %c0_i32 = arith.constant 0 : i32
    %c0_i32_0 = arith.constant 0 : i32
    %c0_i32_1 = arith.constant 0 : i32
    return %c0_i32, %c0_i32_0 : i32, i32
  }
  func.func @transform_6(%arg0: i32) -> (i32, i32) {
    %c0_i32 = arith.constant 0 : i32
    %c0_i32_0 = arith.constant 0 : i32
    %c0_i32_1 = arith.constant 0 : i32
    return %c0_i32, %c0_i32_0 : i32, i32
  }
  func.func @transform_7(%arg0: i32) -> (i32, i32) {
    %c0_i32 = arith.constant 0 : i32
    %c0_i32_0 = arith.constant 0 : i32
    %c0_i32_1 = arith.constant 0 : i32
    return %c0_i32, %c0_i32_0 : i32, i32
  }
  func.func @transform_8(%arg0: i32) -> (i32, i32) {
    %c0_i32 = arith.constant 0 : i32
    %c0_i32_0 = arith.constant 0 : i32
    %c0_i32_1 = arith.constant 0 : i32
    return %c0_i32, %c0_i32_0 : i32, i32
  }
  func.func @transform_9(%arg0: i32) -> (i32, i32, i32) {
    %c0_i32 = arith.constant 0 : i32
    %c0_i32_0 = arith.constant 0 : i32
    %c0_i32_1 = arith.constant 0 : i32
    return %arg0, %c0_i32, %c0_i32_0 : i32, i32, i32
  }
}

</mosaic_0001>

<bundles_post_ra>
// kernel: concatnet_forward.1
= control target key start
LH: loop header
LB: loop body
LE: loop exit
PB: predicated region body
PF: predicated region fallthrough
CT: control target
= control target key end

     0   :  { %v1285_v0 = vmov 0   ;;  %v1286_v46 = vmov 0.0   ;;  %vm270_vm5 = vcmask 654336   ;;  %s1649_s0 = inlined_call_operand.vmem [shape: s32[128,1], index: 0, kind: input, shape index: {}]   ;;  %s1650_s1 = inlined_call_operand.vmem [shape: s32[128,1], index: 1, kind: input, shape index: {}]   ;;  %s1651_s8 = inlined_call_operand.<no memory space> [shape: f32[1,1], index: 8, kind: input, shape index: {}]   ;;  %s1652_s2 = inlined_call_operand.vmem [shape: f32[80,32], index: 2, kind: input, shape index: {}]   ;;  %s1653_s3 = inlined_call_operand.vmem [shape: f32[32,128], index: 3, kind: input, shape index: {}]   ;;  %s1654_s5 = inlined_call_operand.vmem [shape: f32[128,128], index: 5, kind: input, shape index: {}]   ;;  %s1655_s4 = inlined_call_operand.vmem [shape: f32[1,128], index: 4, kind: input, shape index: {}]   ;;  %s1656_s6 = inlined_call_operand.vmem [shape: f32[1,128], index: 6, kind: input, shape index: {}]   ;;  %s1657_s7 = inlined_call_operand.vmem [shape: f32[1,128], index: 7, kind: input, shape index: {}]   ;;  %s1658_s9 = inlined_call_operand.vmem [shape: f32[1,1,128], index: 9, kind: output, shape index: {}]  }
   0x1   :  { %1280 = vset.pattern.permute.xlu1 %v1285_v0  ;;  %1279 = vset.pattern.permute.xlu0 %v1285_v0  ;;  %v35_v1 = vld [vmem:[%s1649_s0 + $0x8] sm:$0xff]  ;;  %v34_v2 = vld [vmem:[%s1649_s0] sm:$0xff]  ;;  %v14_v4 = vstv %s1651_s8  ;;  %v52_v8 = vld [vmem:[%s1650_s1 + $0x10] sm:$0xff]  ;;  %v82_v0 = vlaneseq }
   0x2   :  { %v51_v3 = vld [vmem:[%s1650_s1 + $0x8] sm:$0xff]  ;;  %88 = vperm.xlu1 %1280, %v35_v1   ;;  %85 = vperm.xlu0 %1279, %v34_v2   ;;  %v50_v6 = vld [vmem:[%s1650_s1] sm:$0xff]  ;;  %15 = vst [vmem:[#allocation2] sm:$0x1] %v14_v4  ;;  %v68_v9 = vadd.s32 32, %v52_v8  ;;  %v36_v10 = vld [vmem:[%s1649_s0 + $0x10] sm:$0xff] }
   0x3   :  { %v67_v5 = vadd.s32 32, %v51_v3  ;;  %v66_v7 = vadd.s32 32, %v50_v6  ;;  %v53_v11 = vld [vmem:[%s1650_s1 + $0x18] sm:$0xff]  ;;  %v54_v14 = vld [vmem:[%s1650_s1 + $0x20] sm:$0xff]  ;;  %v269_v15 = vld [vmem:[%s1652_s2 + $0x48] sm:$0xff]  ;;  %v1475_v3 = vand.u32 127, %v82_v0 }
   0x4   :  { %v69_v12 = vadd.s32 32, %v53_v11  ;;  %v37_v13 = vld [vmem:[%s1649_s0 + $0x18] sm:$0xff]  ;;  %1109 = vmatprep.subr.mxu0 %v269_v15  ;;  %v268_v16 = vld [vmem:[%s1652_s2 + $0x40] sm:$0xff]  ;;  %v70_v17 = vadd.s32 32, %v54_v14  ;;  %v55_v19 = vld [vmem:[%s1650_s1 + $0x28] sm:$0xff] }
   0x5   :  { %v38_v18 = vld [vmem:[%s1649_s0 + $0x20] sm:$0xff]  ;;  %1110 = vmatpush3.msra.mxu0 %v269_v15  ;;  %v267_v20 = vld [vmem:[%s1652_s2 + $0x38] sm:$0xff]  ;;  %v71_v21 = vadd.s32 32, %v55_v19  ;;  %v266_v22 = vld [vmem:[%s1652_s2 + $0x30] sm:$0xff] }
   0x6   :  { %152 = vperm.xlu1 %1280, %v67_v5   ;;  %149 = vperm.xlu0 %1279, %v66_v7   ;;  %v39_v23 = vld [vmem:[%s1649_s0 + $0x28] sm:$0xff]  ;;  %v56_v24 = vld [vmem:[%s1650_s1 + $0x30] sm:$0xff]  ;;  %v57_v28 = vld [vmem:[%s1650_s1 + $0x38] sm:$0xff] }
   0x7   :  { %1111 = vmatprep.subr.mxu0 %v268_v16  ;;  %v265_v25 = vld [vmem:[%s1652_s2 + $0x28] sm:$0xff]  ;;  %v72_v26 = vadd.s32 32, %v56_v24  ;;  %v40_v27 = vld [vmem:[%s1649_s0 + $0x30] sm:$0xff]  ;;  %v264_v29 = vld [vmem:[%s1652_s2 + $0x20] sm:$0xff]  ;;  %v73_v30 = vadd.s32 32, %v57_v28 }
   0x8   :  { %1112 = vmatpush3.msra.mxu0 %v268_v16  ;;  %v263_v31 = vld [vmem:[%s1652_s2 + $0x18] sm:$0xff]  ;;  %v58_v33 = vld [vmem:[%s1650_s1 + $0x40] sm:$0xff]  ;;  %v262_v34 = vld [vmem:[%s1652_s2 + $0x10] sm:$0xff] }
   0x9   :  { %1113 = vmatprep.subr.mxu0 %v267_v20  ;;  %v41_v32 = vld [vmem:[%s1649_s0 + $0x38] sm:$0xff]  ;;  %v74_v35 = vadd.s32 32, %v58_v33  ;;  %v42_v36 = vld [vmem:[%s1649_s0 + $0x40] sm:$0xff]  ;;  %v59_v37 = vld [vmem:[%s1650_s1 + $0x48] sm:$0xff] }
   0xa   :  { %155 = vperm.xlu1 %1280, %v68_v9   ;;  %91 = vperm.xlu0 %1279, %v36_v10   ;;  %v261_v38 = vld [vmem:[%s1652_s2 + $0x8] sm:$0xff]  ;;  %v75_v39 = vadd.s32 32, %v59_v37  ;;  %v260_v40 = vld [vmem:[%s1652_s2] sm:$0xff]  ;;  %v60_v42 = vld [vmem:[%s1650_s1 + $0x50] sm:$0xff] }
   0xb   :  { %1114 = vmatpush3.msra.mxu0 %v267_v20  ;;  %v43_v41 = vld [vmem:[%s1649_s0 + $0x48] sm:$0xff]  ;;  %v76_v43 = vadd.s32 32, %v60_v42  ;;  %v44_v44 = vld [vmem:[%s1649_s0 + $0x50] sm:$0xff]  ;;  %v61_v45 = vld [vmem:[%s1650_s1 + $0x58] sm:$0xff] }
   0xc   :  { %1115 = vmatprep.subr.mxu0 %v266_v22  ;;  %v77_v47 = vadd.s32 32, %v61_v45  ;;  %v45_v48 = vld [vmem:[%s1649_s0 + $0x58] sm:$0xff]  ;;  %v62_v49 = vld [vmem:[%s1650_s1 + $0x60] sm:$0xff]  ;;  %v63_v52 = vld [vmem:[%s1650_s1 + $0x68] sm:$0xff] }
   0xd   :  { %1116 = vmatpush3.msra.mxu0 %v266_v22  ;;  %v78_v50 = vadd.s32 32, %v62_v49  ;;  %v46_v51 = vld [vmem:[%s1649_s0 + $0x60] sm:$0xff]  ;;  %v79_v53 = vadd.s32 32, %v63_v52  ;;  %v47_v54 = vld [vmem:[%s1649_s0 + $0x68] sm:$0xff]  ;;  %v64_v55 = vld [vmem:[%s1650_s1 + $0x70] sm:$0xff] }
   0xe   :  { %158 = vperm.xlu1 %1280, %v69_v12   ;;  %94 = vperm.xlu0 %1279, %v37_v13   ;;  %v80_v56 = vadd.s32 32, %v64_v55  ;;  %v48_v57 = vld [vmem:[%s1649_s0 + $0x70] sm:$0xff]  ;;  %v65_v58 = vld [vmem:[%s1650_s1 + $0x78] sm:$0xff]  ;;  %v870_v61 = vld [vmem:[#allocation2] sm:$0x1] }
   0xf   :  { %1117 = vmatprep.subr.mxu0 %v265_v25  ;;  %v81_v59 = vadd.s32 32, %v65_v58  ;;  %v49_v60 = vld [vmem:[%s1649_s0 + $0x78] sm:$0xff]  ;;  %v466_v63 = vld [vmem:[%s1653_s3 + $0x10] sm:$0xff]  ;;  %v464_v52 = vld [vmem:[%s1653_s3] sm:$0xff] }
  0x10   :  { %1118 = vmatpush3.msra.mxu0 %v265_v25  ;;  %v467_v62 = vld [vmem:[%s1653_s3 + $0x18] sm:$0xff] }
  0x11   :  { %1119 = vmatprep.subr.mxu0 %v264_v29  ;;  %1153 = vmatprep.subr.mxu1 %v467_v62 }
  0x12   :  { %161 = vperm.xlu1 %1280, %v70_v17   ;;  %97 = vperm.xlu0 %1279, %v38_v18  }
  0x13   :  { %1120 = vmatpush3.msra.mxu0 %v264_v29  ;;  %1154 = vmatpush3.msra.mxu1 %v467_v62  ;;  %v695_v62 = vld [vmem:[%s1654_s5 + $0x50] sm:$0xff] }
  0x14   :  { %1121 = vmatprep.subr.mxu0 %v263_v31  ;;  %1155 = vmatprep.subr.mxu1 %v466_v63 }
  0x15   :  { %1122 = vmatpush3.msra.mxu0 %v263_v31  ;;  %1156 = vmatpush3.msra.mxu1 %v466_v63  ;;  %v694_v63 = vld [vmem:[%s1654_s5 + $0x48] sm:$0xff] }
  0x16   :  { %164 = vperm.xlu1 %1280, %v71_v21   ;;  %100 = vperm.xlu0 %1279, %v39_v23  }
  0x17   :  { %1123 = vmatprep.subr.mxu0 %v262_v34 }
  0x18   :  { %1124 = vmatpush3.msra.mxu0 %v262_v34 }
  0x19   :  { %1125 = vmatprep.subr.mxu0 %v261_v38 }
  0x1a   :  { %167 = vperm.xlu1 %1280, %v72_v26   ;;  %103 = vperm.xlu0 %1279, %v40_v27  }
  0x1b   :  { %1126 = vmatpush3.msra.mxu0 %v261_v38 }
  0x1c   :  { %1127 = vmatprep.subr.mxu0 %v260_v40 }
  0x1d   :  { %1128 = vmatpush3.msra.mxu0 %v260_v40 }
  0x1e   :  { %170 = vperm.xlu1 %1280, %v73_v30   ;;  %106 = vperm.xlu0 %1279, %v41_v32  }
  0x1f   :  { %1241 = vmatprep.subr.mxu0 %v1286_v46 }
  0x22   :  { %173 = vperm.xlu1 %1280, %v74_v35   ;;  %109 = vperm.xlu0 %1279, %v42_v36  }
  0x26   :  { %176 = vperm.xlu1 %1280, %v75_v39   ;;  %112 = vperm.xlu0 %1279, %v43_v41  }
  0x2a   :  { %179 = vperm.xlu1 %1280, %v76_v43   ;;  %115 = vperm.xlu0 %1279, %v44_v44  }
  0x2e   :  { %182 = vperm.xlu1 %1280, %v77_v47   ;;  %118 = vperm.xlu0 %1279, %v45_v48  }
  0x32   :  { %185 = vperm.xlu1 %1280, %v78_v50   ;;  %121 = vperm.xlu0 %1279, %v46_v51   ;;  %v465_v51 = vld [vmem:[%s1653_s3 + $0x8] sm:$0xff] }
  0x33   :  { %1157 = vmatprep.subr.mxu1 %v465_v51 }
  0x34   :  { %1158 = vmatpush3.msra.mxu1 %v465_v51 }
  0x35   :  { %1159 = vmatprep.subr.mxu1 %v464_v52 }
  0x36   :  { %188 = vperm.xlu1 %1280, %v79_v53   ;;  %124 = vperm.xlu0 %1279, %v47_v54   ;;  %v700_v53 = vld [vmem:[%s1654_s5 + $0x78] sm:$0xff] }
  0x37   :  { %1160 = vmatpush3.msra.mxu1 %v464_v52 }
  0x38   :  { %1185 = vmatprep.subr.mxu1 %v700_v53 }
  0x3a   :  { %191 = vperm.xlu1 %1280, %v80_v56   ;;  %127 = vperm.xlu0 %1279, %v48_v57   ;;  %v699_v56 = vld [vmem:[%s1654_s5 + $0x70] sm:$0xff]  ;;  %v698_v57 = vld [vmem:[%s1654_s5 + $0x68] sm:$0xff] }
  0x3e   :  { %194 = vperm.xlu1 %1280, %v81_v59   ;;  %130 = vperm.xlu0 %1279, %v49_v60   ;;  %v697_v59 = vld [vmem:[%s1654_s5 + $0x60] sm:$0xff] }
  0x42   :  { %873 = vperm.xlu0 %1279, %v870_v61   ;;  %v696_v61 = vld [vmem:[%s1654_s5 + $0x58] sm:$0xff] }
  0x7d   :  { %v89_v1 = vpop.permute.xlu1 %88  ;;  %v86_v2 = vpop.permute.xlu0 %85 }
  0x7e   :  { %vm133_vm0 = vcmp.eq.s32.totalorder %v1475_v3, %v89_v1  ;;  %vm132_vm3 = vcmp.eq.s32.totalorder %v1475_v3, %v86_v2  ;;  %v693_v2 = vld [vmem:[%s1654_s5 + $0x40] sm:$0xff] }
  0x81   :  { %v153_v4 = vpop.permute.xlu1 %152  ;;  %v150_v5 = vpop.permute.xlu0 %149 }
  0x82   :  { %vm197_vm1 = vcmp.eq.s32.totalorder %v1475_v3, %v153_v4  ;;  %vm196_vm2 = vcmp.eq.s32.totalorder %v1475_v3, %v150_v5  ;;  %v692_v4 = vld [vmem:[%s1654_s5 + $0x38] sm:$0xff]  ;;  %v691_v5 = vld [vmem:[%s1654_s5 + $0x30] sm:$0xff] }
  0x83   :  { %vm213_vm4 = vmor %vm133_vm0, %vm197_vm1 }
  0x84   :  { %v964_v6 = vsel %vm213_vm4, 1.0, %v1286_v46  ;;  %vm212_vm6 = vmor %vm132_vm3, %vm196_vm2 }
  0x85   :  { %v156_v7 = vpop.permute.xlu1 %155  ;;  %v963_v8 = vsel %vm212_vm6, 1.0, %v1286_v46  ;;  %v92_v9 = vpop.permute.xlu0 %91 }
  0x86   :  { %vm198_vm7 = vcmp.eq.s32.totalorder %v1475_v3, %v156_v7  ;;  %1129 = vmatprep.mubr.msk.f32.mxu0 %vm270_vm5, %v963_v8  ;;  %vm134_vm8 = vcmp.eq.s32.totalorder %v1475_v3, %v92_v9  ;;  %v689_v8 = vld [vmem:[%s1654_s5 + $0x20] sm:$0xff] }
  0x87   :  { %vm214_vm9 = vmor %vm134_vm8, %vm198_vm7  ;;  %1130 = vmatmul.mubr.msk.f32.vlgmr.msra.gmra.mxu0 %vm270_vm5, %v964_v6  ;;  %v690_v6 = vld [vmem:[%s1654_s5 + $0x28] sm:$0xff] }
  0x88   :  { %v965_v10 = vsel %vm214_vm9, 1.0, %v1286_v46 }
  0x89   :  { %v159_v11 = vpop.permute.xlu1 %158  ;;  %1132 = vmatprep.mubr.msk.f32.mxu0 %vm270_vm5, %v965_v10  ;;  %v95_v12 = vpop.permute.xlu0 %94 }
  0x8a   :  { %vm199_vm10 = vcmp.eq.s32.totalorder %v1475_v3, %v159_v11  ;;  %vm135_vm11 = vcmp.eq.s32.totalorder %v1475_v3, %v95_v12 }
  0x8b   :  { %vm215_vm12 = vmor %vm135_vm11, %vm199_vm10 }
  0x8c   :  { %v966_v13 = vsel %vm215_vm12, 1.0, %v1286_v46 }
  0x8d   :  { %v162_v14 = vpop.permute.xlu1 %161  ;;  %1133 = vmatmul.mubr.msk.f32.gmra.mxu0 %vm270_vm5, %v966_v13  ;;  %v98_v15 = vpop.permute.xlu0 %97 }
  0x8e   :  { %vm200_vm13 = vcmp.eq.s32.totalorder %v1475_v3, %v162_v14  ;;  %vm136_vm14 = vcmp.eq.s32.totalorder %v1475_v3, %v98_v15 }
  0x8f   :  { %vm216_vm15 = vmor %vm136_vm14, %vm200_vm13 }
  0x90   :  { %v967_v16 = vsel %vm216_vm15, 1.0, %v1286_v46 }
  0x91   :  { %v165_v17 = vpop.permute.xlu1 %164  ;;  %1135 = vmatprep.mubr.msk.f32.mxu0 %vm270_vm5, %v967_v16  ;;  %v101_v18 = vpop.permute.xlu0 %100 }
  0x92   :  { %vm201_vm0 = vcmp.eq.s32.totalorder %v1475_v3, %v165_v17  ;;  %vm137_vm1 = vcmp.eq.s32.totalorder %v1475_v3, %v101_v18  ;;  %v688_v18 = vld [vmem:[%s1654_s5 + $0x18] sm:$0xff] }
  0x93   :  { %vm217_vm2 = vmor %vm137_vm1, %vm201_vm0 }
  0x94   :  { %v968_v19 = vsel %vm217_vm2, 1.0, %v1286_v46 }
  0x95   :  { %v168_v20 = vpop.permute.xlu1 %167  ;;  %1136 = vmatmul.mubr.msk.f32.gmra.mxu0 %vm270_vm5, %v968_v19  ;;  %v104_v21 = vpop.permute.xlu0 %103  ;;  %v687_v19 = vld [vmem:[%s1654_s5 + $0x10] sm:$0xff] }
  0x96   :  { %vm202_vm3 = vcmp.eq.s32.totalorder %v1475_v3, %v168_v20  ;;  %vm138_vm4 = vcmp.eq.s32.totalorder %v1475_v3, %v104_v21  ;;  %v686_v20 = vld [vmem:[%s1654_s5 + $0x8] sm:$0xff]  ;;  %v685_v21 = vld [vmem:[%s1654_s5] sm:$0xff] }
  0x97   :  { %vm218_vm6 = vmor %vm138_vm4, %vm202_vm3 }
  0x98   :  { %v969_v22 = vsel %vm218_vm6, 1.0, %v1286_v46 }
  0x99   :  { %v171_v23 = vpop.permute.xlu1 %170  ;;  %1138 = vmatprep.mubr.msk.f32.mxu0 %vm270_vm5, %v969_v22  ;;  %v107_v24 = vpop.permute.xlu0 %106  ;;  %v995_v22 = vld [vmem:[%s1655_s4] ss:$0 sm:$0xff] }
  0x9a   :  { %vm203_vm7 = vcmp.eq.s32.totalorder %v1475_v3, %v171_v23  ;;  %vm139_vm8 = vcmp.eq.s32.totalorder %v1475_v3, %v107_v24 }
  0x9b   :  { %vm219_vm9 = vmor %vm139_vm8, %vm203_vm7 }
  0x9c   :  { %v970_v25 = vsel %vm219_vm9, 1.0, %v1286_v46 }
  0x9d   :  { %v174_v26 = vpop.permute.xlu1 %173  ;;  %1139 = vmatmul.mubr.msk.f32.gmra.mxu0 %vm270_vm5, %v970_v25  ;;  %v110_v27 = vpop.permute.xlu0 %109 }
  0x9e   :  { %vm204_vm10 = vcmp.eq.s32.totalorder %v1475_v3, %v174_v26  ;;  %vm140_vm11 = vcmp.eq.s32.totalorder %v1475_v3, %v110_v27 }
  0x9f   :  { %vm220_vm12 = vmor %vm140_vm11, %vm204_vm10 }
  0xa0   :  { %v971_v28 = vsel %vm220_vm12, 1.0, %v1286_v46 }
  0xa1   :  { %v177_v29 = vpop.permute.xlu1 %176  ;;  %1141 = vmatprep.mubr.msk.f32.mxu0 %vm270_vm5, %v971_v28  ;;  %v113_v30 = vpop.permute.xlu0 %112 }
  0xa2   :  { %vm205_vm13 = vcmp.eq.s32.totalorder %v1475_v3, %v177_v29  ;;  %vm141_vm14 = vcmp.eq.s32.totalorder %v1475_v3, %v113_v30 }
  0xa3   :  { %vm221_vm15 = vmor %vm141_vm14, %vm205_vm13 }
  0xa4   :  { %v972_v31 = vsel %vm221_vm15, 1.0, %v1286_v46 }
  0xa5   :  { %v180_v32 = vpop.permute.xlu1 %179  ;;  %1142 = vmatmul.mubr.msk.f32.gmra.mxu0 %vm270_vm5, %v972_v31  ;;  %v116_v33 = vpop.permute.xlu0 %115 }
  0xa6   :  { %vm206_vm0 = vcmp.eq.s32.totalorder %v1475_v3, %v180_v32  ;;  %vm142_vm1 = vcmp.eq.s32.totalorder %v1475_v3, %v116_v33 }
  0xa7   :  { %vm222_vm2 = vmor %vm142_vm1, %vm206_vm0 }
  0xa8   :  { %v973_v34 = vsel %vm222_vm2, 1.0, %v1286_v46 }
  0xa9   :  { %v183_v35 = vpop.permute.xlu1 %182  ;;  %1144 = vmatprep.mubr.msk.f32.mxu0 %vm270_vm5, %v973_v34  ;;  %v119_v36 = vpop.permute.xlu0 %118 }
  0xaa   :  { %vm207_vm3 = vcmp.eq.s32.totalorder %v1475_v3, %v183_v35  ;;  %vm143_vm4 = vcmp.eq.s32.totalorder %v1475_v3, %v119_v36 }
  0xab   :  { %vm223_vm6 = vmor %vm143_vm4, %vm207_vm3  ;;  %vm475_vm3 = vcmask 261120  }
  0xac   :  { %v974_v37 = vsel %vm223_vm6, 1.0, %v1286_v46 }
  0xad   :  { %v186_v38 = vpop.permute.xlu1 %185  ;;  %1145 = vmatmul.mubr.msk.f32.gmra.mxu0 %vm270_vm5, %v974_v37  ;;  %v122_v39 = vpop.permute.xlu0 %121 }
  0xae   :  { %vm208_vm7 = vcmp.eq.s32.totalorder %v1475_v3, %v186_v38  ;;  %vm144_vm8 = vcmp.eq.s32.totalorder %v1475_v3, %v122_v39 }
  0xaf   :  { %vm224_vm9 = vmor %vm144_vm8, %vm208_vm7 }
  0xb0   :  { %v975_v40 = vsel %vm224_vm9, 1.0, %v1286_v46 }
  0xb1   :  { %v189_v41 = vpop.permute.xlu1 %188  ;;  %1147 = vmatprep.mubr.msk.f32.mxu0 %vm270_vm5, %v975_v40  ;;  %v125_v42 = vpop.permute.xlu0 %124 }
  0xb2   :  { %vm209_vm10 = vcmp.eq.s32.totalorder %v1475_v3, %v189_v41  ;;  %vm145_vm11 = vcmp.eq.s32.totalorder %v1475_v3, %v125_v42 }
  0xb3   :  { %vm225_vm12 = vmor %vm145_vm11, %vm209_vm10 }
  0xb4   :  { %v976_v43 = vsel %vm225_vm12, 1.0, %v1286_v46 }
  0xb5   :  { %v192_v44 = vpop.permute.xlu1 %191  ;;  %1148 = vmatmul.mubr.msk.f32.gmra.mxu0 %vm270_vm5, %v976_v43  ;;  %v128_v45 = vpop.permute.xlu0 %127 }
  0xb6   :  { %vm210_vm13 = vcmp.eq.s32.totalorder %v1475_v3, %v192_v44  ;;  %vm146_vm14 = vcmp.eq.s32.totalorder %v1475_v3, %v128_v45 }
  0xb7   :  { %vm226_vm15 = vmor %vm146_vm14, %vm210_vm13 }
  0xb8   :  { %v977_v47 = vsel %vm226_vm15, 1.0, %v1286_v46 }
  0xb9   :  { %v195_v48 = vpop.permute.xlu1 %194  ;;  %1150 = vmatprep.mubr.msk.f32.mxu0 %vm270_vm5, %v977_v47  ;;  %v131_v49 = vpop.permute.xlu0 %130 }
  0xba   :  { %vm211_vm0 = vcmp.eq.s32.totalorder %v1475_v3, %v195_v48  ;;  %vm147_vm1 = vcmp.eq.s32.totalorder %v1475_v3, %v131_v49 }
  0xbb   :  { %vm227_vm2 = vmor %vm147_vm1, %vm211_vm0 }
  0xbc   :  { %v978_v50 = vsel %vm227_vm2, 1.0, %v1286_v46 }
  0xbd   :  { %1151 = vmatmul.mubr.msk.f32.gmra.mxu0 %vm270_vm5, %v978_v50  ;;  %vm1287_vm5 = vmmov 0  }
  0xbe   :  { %1273 = vmatprep.mubr.msk.f32.mxu0 %vm1287_vm5, %v1286_v46 }
 0x147   :  { %v1131_v54 = vpop.f32.mrf.mxu0 }
 0x149   :  { %v385_v55 = vpop.f32.mrf.mxu0 }
 0x14a   :  { %1161 = vmatprep.mubr.msk.f32.mxu1 %vm475_vm3, %v385_v55 }
 0x14b   :  { %1162 = vmatmul.mubr.msk.f32.vlgmr.msra.gmra.mxu1 %vm475_vm3, %v1131_v54 }
 0x14c   :  { %1186 = vmatpush3.msra.mxu1 %v700_v53 }
 0x14d   :  { %v1134_v58 = vpop.f32.mrf.mxu0  ;;  %1187 = vmatprep.subr.mxu1 %v699_v56 }
 0x14e   :  { %1188 = vmatpush3.msra.mxu1 %v699_v56 }
 0x14f   :  { %v395_v60 = vpop.f32.mrf.mxu0  ;;  %1189 = vmatprep.subr.mxu1 %v698_v57 }
 0x150   :  { %1164 = vmatprep.mubr.msk.f32.mxu1 %vm475_vm3, %v395_v60  ;;  %1190 = vmatpush3.msra.mxu1 %v698_v57 }
 0x151   :  { %1165 = vmatmul.mubr.msk.f32.gmra.mxu1 %vm475_vm3, %v1134_v58  ;;  %1191 = vmatprep.subr.mxu1 %v697_v59 }
 0x152   :  { %1192 = vmatpush3.msra.mxu1 %v697_v59 }
 0x153   :  { %1193 = vmatprep.subr.mxu1 %v696_v61 }
 0x154   :  { %1194 = vmatpush3.msra.mxu1 %v696_v61 }
 0x155   :  { %v1137_v1 = vpop.f32.mrf.mxu0  ;;  %1195 = vmatprep.subr.mxu1 %v695_v62 }
 0x156   :  { %1196 = vmatpush3.msra.mxu1 %v695_v62 }
 0x157   :  { %v405_v3 = vpop.f32.mrf.mxu0  ;;  %1197 = vmatprep.subr.mxu1 %v694_v63 }
 0x158   :  { %1167 = vmatprep.mubr.msk.f32.mxu1 %vm475_vm3, %v405_v3  ;;  %1198 = vmatpush3.msra.mxu1 %v694_v63 }
 0x159   :  { %1168 = vmatmul.mubr.msk.f32.gmra.mxu1 %vm475_vm3, %v1137_v1  ;;  %1199 = vmatprep.subr.mxu1 %v693_v2 }
 0x15a   :  { %1200 = vmatpush3.msra.mxu1 %v693_v2 }
 0x15b   :  { %1201 = vmatprep.subr.mxu1 %v692_v4 }
 0x15c   :  { %1202 = vmatpush3.msra.mxu1 %v692_v4 }
 0x15d   :  { %v1140_v7 = vpop.f32.mrf.mxu0  ;;  %1203 = vmatprep.subr.mxu1 %v691_v5 }
 0x15e   :  { %1204 = vmatpush3.msra.mxu1 %v691_v5 }
 0x15f   :  { %v415_v9 = vpop.f32.mrf.mxu0  ;;  %1205 = vmatprep.subr.mxu1 %v690_v6 }
 0x160   :  { %1170 = vmatprep.mubr.msk.f32.mxu1 %vm475_vm3, %v415_v9  ;;  %1206 = vmatpush3.msra.mxu1 %v690_v6 }
 0x161   :  { %1171 = vmatmul.mubr.msk.f32.gmra.mxu1 %vm475_vm3, %v1140_v7  ;;  %1207 = vmatprep.subr.mxu1 %v689_v8 }
 0x162   :  { %1208 = vmatpush3.msra.mxu1 %v689_v8 }
 0x163   :  { %1209 = vmatprep.subr.mxu1 %v688_v18 }
 0x164   :  { %1210 = vmatpush3.msra.mxu1 %v688_v18 }
 0x165   :  { %v1143_v10 = vpop.f32.mrf.mxu0  ;;  %1211 = vmatprep.subr.mxu1 %v687_v19 }
 0x166   :  { %1212 = vmatpush3.msra.mxu1 %v687_v19 }
 0x167   :  { %v425_v11 = vpop.f32.mrf.mxu0  ;;  %1213 = vmatprep.subr.mxu1 %v686_v20 }
 0x168   :  { %1173 = vmatprep.mubr.msk.f32.mxu1 %vm475_vm3, %v425_v11  ;;  %1214 = vmatpush3.msra.mxu1 %v686_v20 }
 0x169   :  { %1174 = vmatmul.mubr.msk.f32.gmra.mxu1 %vm475_vm3, %v1143_v10  ;;  %1215 = vmatprep.subr.mxu1 %v685_v21 }
 0x16a   :  { %1216 = vmatpush3.msra.mxu1 %v685_v21 }
 0x16d   :  { %v1146_v12 = vpop.f32.mrf.mxu0 }
 0x16f   :  { %v435_v13 = vpop.f32.mrf.mxu0 }
 0x170   :  { %1176 = vmatprep.mubr.msk.f32.mxu1 %vm475_vm3, %v435_v13 }
 0x171   :  { %1177 = vmatmul.mubr.msk.f32.gmra.mxu1 %vm475_vm3, %v1146_v12 }
 0x175   :  { %v1149_v14 = vpop.f32.mrf.mxu0 }
 0x177   :  { %v445_v15 = vpop.f32.mrf.mxu0 }
 0x178   :  { %1179 = vmatprep.mubr.msk.f32.mxu1 %vm475_vm3, %v445_v15 }
 0x179   :  { %1180 = vmatmul.mubr.msk.f32.gmra.mxu1 %vm475_vm3, %v1149_v14 }
 0x17d   :  { %v1152_v16 = vpop.f32.mrf.mxu0 }
 0x17f   :  { %v455_v17 = vpop.f32.mrf.mxu0 }
 0x180   :  { %1182 = vmatprep.mubr.msk.f32.mxu1 %vm475_vm3, %v455_v17 }
 0x181   :  { %1183 = vmatmul.mubr.msk.f32.gmra.mxu1 %vm475_vm3, %v1152_v16 }
 0x20b   :  { %v1163_v23 = vpop.f32.mrf.mxu1 }
 0x20c   :  { %v596_v24 = vadd.f32 %v1163_v23, %v995_v22  ;;  %v1012_v23 = vld [vmem:[%s1656_s6] ss:$0 sm:$0xff] }
 0x20d   :  { %v590_v25 = vpop.f32.mrf.mxu1 }
 0x20e   :  { %v591_v26 = vadd.f32 %v995_v22, %v590_v25  ;;  %v670_v28 = vmax.f32 %v596_v24, 0.0 }
 0x210   :  { %v669_v27 = vmax.f32 %v591_v26, 0.0 }
 0x211   :  { %v1166_v29 = vpop.f32.mrf.mxu1 }
 0x212   :  { %1217 = vmatprep.mubr.f32.mxu1 %v669_v27  ;;  %v606_v30 = vadd.f32 %v1166_v29, %v995_v22 }
 0x213   :  { %1218 = vmatmul.mubr.f32.vlgmr.msra.gmra.mxu1 %v670_v28  ;;  %v600_v31 = vpop.f32.mrf.mxu1 }
 0x214   :  { %v601_v32 = vadd.f32 %v995_v22, %v600_v31  ;;  %v672_v34 = vmax.f32 %v606_v30, 0.0 }
 0x216   :  { %v671_v33 = vmax.f32 %v601_v32, 0.0 }
 0x218   :  { %1220 = vmatprep.mubr.f32.mxu1 %v671_v33 }
 0x219   :  { %v1169_v35 = vpop.f32.mrf.mxu1  ;;  %1221 = vmatmul.mubr.f32.gmra.mxu1 %v672_v34 }
 0x21a   :  { %v616_v36 = vadd.f32 %v1169_v35, %v995_v22 }
 0x21b   :  { %v610_v37 = vpop.f32.mrf.mxu1 }
 0x21c   :  { %v611_v38 = vadd.f32 %v995_v22, %v610_v37  ;;  %v674_v40 = vmax.f32 %v616_v36, 0.0 }
 0x21e   :  { %v673_v39 = vmax.f32 %v611_v38, 0.0 }
 0x220   :  { %1223 = vmatprep.mubr.f32.mxu1 %v673_v39 }
 0x221   :  { %v1172_v41 = vpop.f32.mrf.mxu1  ;;  %1224 = vmatmul.mubr.f32.gmra.mxu1 %v674_v40 }
 0x222   :  { %v626_v42 = vadd.f32 %v1172_v41, %v995_v22 }
 0x223   :  { %v620_v43 = vpop.f32.mrf.mxu1 }
 0x224   :  { %v621_v44 = vadd.f32 %v995_v22, %v620_v43  ;;  %v676_v47 = vmax.f32 %v626_v42, 0.0 }
 0x226   :  { %v675_v45 = vmax.f32 %v621_v44, 0.0 }
 0x228   :  { %1226 = vmatprep.mubr.f32.mxu1 %v675_v45 }
 0x229   :  { %v1175_v48 = vpop.f32.mrf.mxu1  ;;  %1227 = vmatmul.mubr.f32.gmra.mxu1 %v676_v47 }
 0x22a   :  { %v636_v49 = vadd.f32 %v1175_v48, %v995_v22 }
 0x22b   :  { %v630_v50 = vpop.f32.mrf.mxu1 }
 0x22c   :  { %v631_v51 = vadd.f32 %v995_v22, %v630_v50  ;;  %v678_v53 = vmax.f32 %v636_v49, 0.0 }
 0x22e   :  { %v677_v52 = vmax.f32 %v631_v51, 0.0 }
 0x230   :  { %1229 = vmatprep.mubr.f32.mxu1 %v677_v52 }
 0x231   :  { %v1178_v54 = vpop.f32.mrf.mxu1  ;;  %1230 = vmatmul.mubr.f32.gmra.mxu1 %v678_v53 }
 0x232   :  { %v646_v55 = vadd.f32 %v1178_v54, %v995_v22 }
 0x233   :  { %v640_v56 = vpop.f32.mrf.mxu1 }
 0x234   :  { %v641_v57 = vadd.f32 %v995_v22, %v640_v56  ;;  %v680_v59 = vmax.f32 %v646_v55, 0.0 }
 0x236   :  { %v679_v58 = vmax.f32 %v641_v57, 0.0 }
 0x238   :  { %1232 = vmatprep.mubr.f32.mxu1 %v679_v58 }
 0x239   :  { %v1181_v60 = vpop.f32.mrf.mxu1  ;;  %1233 = vmatmul.mubr.f32.gmra.mxu1 %v680_v59  ;;  %v869_v59 = vld [vmem:[%s1657_s7] sm:$0x1] }
 0x23a   :  { %v656_v61 = vadd.f32 %v1181_v60, %v995_v22  ;;  %v877_v60 = vshrl.u32 %v82_v0, 7 }
 0x23b   :  { %v650_v62 = vpop.f32.mrf.mxu1 }
 0x23c   :  { %v651_v63 = vadd.f32 %v995_v22, %v650_v62  ;;  %v682_v2 = vmax.f32 %v656_v61, 0.0  ;;  %v878_v61 = vsub.s32 0, %v877_v60  ;;  %v874_v62 = vpop.permute.xlu0 %873 }
 0x23e   :  { %v681_v1 = vmax.f32 %v651_v63, 0.0  ;;  %v879_v63 = vrot.slane %v874_v62, %v878_v61 }
 0x240   :  { %1235 = vmatprep.mubr.f32.mxu1 %v681_v1 }
 0x241   :  { %v1184_v3 = vpop.f32.mrf.mxu1  ;;  %1236 = vmatmul.mubr.f32.gmra.mxu1 %v682_v2 }
 0x242   :  { %v666_v4 = vadd.f32 %v1184_v3, %v995_v22 }
 0x243   :  { %v660_v5 = vpop.f32.mrf.mxu1 }
 0x244   :  { %v661_v6 = vadd.f32 %v995_v22, %v660_v5  ;;  %v684_v8 = vmax.f32 %v666_v4, 0.0 }
 0x246   :  { %v683_v7 = vmax.f32 %v661_v6, 0.0 }
 0x248   :  { %1238 = vmatprep.mubr.f32.mxu1 %v683_v7 }
 0x249   :  { %1239 = vmatmul.mubr.f32.gmra.mxu1 %v684_v8 }
 0x2d3   :  { %v1615_v9 = vpop.f32.mrf.mxu1 }
 0x2d4   :  { %v780_v54 = vadd.f32 %v1615_v9, %v1012_v23 }
 0x2d5   :  { %v1617_v10 = vpop.f32.mrf.mxu1 }
 0x2d6   :  { %v854_v56 = vmax.f32 %v780_v54, 0.0  ;;  %v775_v57 = vadd.f32 %v1012_v23, %v1617_v10 }
 0x2d8   :  { %v853_v58 = vmax.f32 %v775_v57, 0.0 }
 0x2d9   :  { %v1222_v11 = vpop.f32.mrf.mxu1 }
 0x2da   :  { %v790_v50 = vadd.f32 %v1222_v11, %v1012_v23 }
 0x2db   :  { %v1619_v12 = vpop.f32.mrf.mxu1 }
 0x2dc   :  { %v856_v52 = vmax.f32 %v790_v50, 0.0  ;;  %v785_v53 = vadd.f32 %v1012_v23, %v1619_v12 }
 0x2de   :  { %v855_v55 = vmax.f32 %v785_v53, 0.0 }
 0x2e1   :  { %v1225_v13 = vpop.f32.mrf.mxu1 }
 0x2e2   :  { %v800_v45 = vadd.f32 %v1225_v13, %v1012_v23 }
 0x2e3   :  { %v794_v14 = vpop.f32.mrf.mxu1 }
 0x2e4   :  { %v858_v48 = vmax.f32 %v800_v45, 0.0  ;;  %v795_v49 = vadd.f32 %v1012_v23, %v794_v14 }
 0x2e6   :  { %v857_v51 = vmax.f32 %v795_v49, 0.0 }
 0x2e9   :  { %v1228_v15 = vpop.f32.mrf.mxu1 }
 0x2ea   :  { %v810_v41 = vadd.f32 %v1228_v15, %v1012_v23 }
 0x2eb   :  { %v804_v16 = vpop.f32.mrf.mxu1 }
 0x2ec   :  { %v860_v43 = vmax.f32 %v810_v41, 0.0  ;;  %v805_v44 = vadd.f32 %v1012_v23, %v804_v16 }
 0x2ee   :  { %v859_v47 = vmax.f32 %v805_v44, 0.0 }
 0x2f1   :  { %v1231_v17 = vpop.f32.mrf.mxu1 }
 0x2f2   :  { %v820_v37 = vadd.f32 %v1231_v17, %v1012_v23 }
 0x2f3   :  { %v814_v18 = vpop.f32.mrf.mxu1 }
 0x2f4   :  { %v862_v39 = vmax.f32 %v820_v37, 0.0  ;;  %v815_v40 = vadd.f32 %v1012_v23, %v814_v18 }
 0x2f6   :  { %v861_v42 = vmax.f32 %v815_v40, 0.0 }
 0x2f9   :  { %v1234_v19 = vpop.f32.mrf.mxu1 }
 0x2fa   :  { %v830_v33 = vadd.f32 %v1234_v19, %v1012_v23 }
 0x2fb   :  { %v824_v20 = vpop.f32.mrf.mxu1 }
 0x2fc   :  { %v864_v35 = vmax.f32 %v830_v33, 0.0  ;;  %v825_v36 = vadd.f32 %v1012_v23, %v824_v20 }
 0x2fe   :  { %v863_v38 = vmax.f32 %v825_v36, 0.0 }
 0x301   :  { %v1237_v21 = vpop.f32.mrf.mxu1 }
 0x302   :  { %v840_v29 = vadd.f32 %v1237_v21, %v1012_v23 }
 0x303   :  { %v834_v22 = vpop.f32.mrf.mxu1 }
 0x304   :  { %v866_v31 = vmax.f32 %v840_v29, 0.0  ;;  %v835_v32 = vadd.f32 %v1012_v23, %v834_v22 }
 0x306   :  { %v865_v34 = vmax.f32 %v835_v32, 0.0 }
 0x309   :  { %v1240_v24 = vpop.f32.mrf.mxu1 }
 0x30a   :  { %v850_v25 = vadd.f32 %v1240_v24, %v1012_v23 }
 0x30b   :  { %v844_v26 = vpop.f32.mrf.mxu1 }
 0x30c   :  { %v868_v27 = vmax.f32 %v850_v25, 0.0  ;;  %v845_v28 = vadd.f32 %v1012_v23, %v844_v26 }
 0x30e   :  { %1242 = vmatpush3.xpose.msra.mxu0 %v868_v27  ;;  %v867_v30 = vmax.f32 %v845_v28, 0.0 }
 0x30f   :  { %1243 = vmatprep.subr.mxu0 %v1286_v46 }
 0x312   :  { %1244 = vmatpush3.xpose.msra.mxu0 %v867_v30 }
 0x313   :  { %1245 = vmatprep.subr.mxu0 %v1286_v46 }
 0x316   :  { %1246 = vmatpush3.xpose.msra.mxu0 %v866_v31 }
 0x317   :  { %1247 = vmatprep.subr.mxu0 %v1286_v46 }
 0x31a   :  { %1248 = vmatpush3.xpose.msra.mxu0 %v865_v34 }
 0x31b   :  { %1249 = vmatprep.subr.mxu0 %v1286_v46 }
 0x31e   :  { %1250 = vmatpush3.xpose.msra.mxu0 %v864_v35 }
 0x31f   :  { %1251 = vmatprep.subr.mxu0 %v1286_v46 }
 0x322   :  { %1252 = vmatpush3.xpose.msra.mxu0 %v863_v38 }
 0x323   :  { %1253 = vmatprep.subr.mxu0 %v1286_v46 }
 0x326   :  { %1254 = vmatpush3.xpose.msra.mxu0 %v862_v39 }
 0x327   :  { %1255 = vmatprep.subr.mxu0 %v1286_v46 }
 0x32a   :  { %1256 = vmatpush3.xpose.msra.mxu0 %v861_v42 }
 0x32b   :  { %1257 = vmatprep.subr.mxu0 %v1286_v46 }
 0x32e   :  { %1258 = vmatpush3.xpose.msra.mxu0 %v860_v43 }
 0x32f   :  { %1259 = vmatprep.subr.mxu0 %v1286_v46 }
 0x332   :  { %1260 = vmatpush3.xpose.msra.mxu0 %v859_v47 }
 0x333   :  { %1261 = vmatprep.subr.mxu0 %v1286_v46 }
 0x336   :  { %1262 = vmatpush3.xpose.msra.mxu0 %v858_v48 }
 0x337   :  { %1263 = vmatprep.subr.mxu0 %v1286_v46 }
 0x33a   :  { %1264 = vmatpush3.xpose.msra.mxu0 %v857_v51 }
 0x33b   :  { %1265 = vmatprep.subr.mxu0 %v1286_v46 }
 0x33e   :  { %1266 = vmatpush3.xpose.msra.mxu0 %v856_v52 }
 0x33f   :  { %1267 = vmatprep.subr.mxu0 %v1286_v46 }
 0x342   :  { %1268 = vmatpush3.xpose.msra.mxu0 %v855_v55 }
 0x343   :  { %1269 = vmatprep.subr.mxu0 %v1286_v46 }
 0x346   :  { %1270 = vmatpush3.xpose.msra.mxu0 %v854_v56 }
 0x347   :  { %1271 = vmatprep.subr.mxu0 %v1286_v46 }
 0x34a   :  { %1272 = vmatpush3.xpose.msra.mxu0 %v853_v58 }
 0x34d   :  { %1274 = vmatmul.mubr.f32.vlgmr.msra.gmra.mxu0 %v869_v59 }
 0x40d   :  { %v946_v1 = vpop.f32.mrf.mxu0 }
 0x40e   :  { %v947_v2 = vadd.f32 %v946_v1, %v879_v63 }
 0x40f   :  { %v1275_v3 = vpop.f32.mrf.mxu0 }
 0x410   :  { %v1013_v4 = vmul.f32 -1.442695, %v947_v2 }
 0x412   :  { %1281 = vpow2.f32 %v1013_v4 }
 0x41f   :  { %v1282_v5 = vpop.eup %1281 }
 0x420   :  { %v953_v6 = vadd.f32 1.0, %v1282_v5 }
 0x422   :  { %1283 = vrcp.f32 %v953_v6 }
 0x42f   :  { %v1284_v46 = vpop.eup %1283 }
 0x430   :  { %v956_v7 = vmul.f32 4.0, %v1284_v46 }
 0x432   :  { %v957_v8 = vadd.f32 1.0, %v956_v7 }
 0x434   :  { %958 = vst [vmem:[%s1658_s9] sm:$0x1] %v957_v8 }

</bundles_post_ra>
